<compile_context>
chip_gen: v6e
topology: v6e:2x2x1
jax: 0.10.0
libtpu: 0.0.40
codegen_flags: <defaults>
</compile_context>

<pallas_src>
import functools

import jax
import jax.numpy as jnp
from jax.experimental import pallas as pl
from jax.experimental.pallas import tpu as pltpu

LANES = 128
SUBLANES = 8
MAX_TILE_ROWS = 1024  # 1024x128 f32 block = 512 KiB -> near HBM-roofline knee


def _focal_loss_kernel(x_ref, t_ref, out_ref, acc_ref, *, gamma,
                       n_rows, tile_rows, tiles_per_core, needs_mask):
    c = pl.program_id(0)          # core-split axis ("parallel")
    i = pl.program_id(1)          # row-tile axis ("arbitrary", reduction)

    @pl.when(i == 0)
    def _():
        acc_ref[...] = jnp.zeros_like(acc_ref)

    # Cast in-kernel (inputs arrive in their native dtype).
    x = x_ref[...].astype(jnp.float32)
    t = t_ref[...].astype(jnp.float32)

    # Numerically-stable BCE with logits (torch's formulation):
    #   bce = max(x, 0) - x*t + log1p(exp(-|x|))
    bce = jnp.maximum(x, 0.0) - x * t + jnp.log1p(jnp.exp(-jnp.abs(x)))
    # pt**gamma * bce == exp(-gamma*bce) * bce  (single exp, no float pow).
    # `alpha` and the 1/N mean are applied to the final scalar in the wrapper.
    f = jnp.exp(-gamma * bce) * bce

    if needs_mask:
        # Only tiles at/after `first_ragged` can contain rows past the end of
        # the slab; earlier tiles accumulate unmasked (pure VPU add).
        t_global = c * tiles_per_core + i
        first_ragged = n_rows // tile_rows

        @pl.when(t_global < first_ragged)
        def _():
            acc_ref[...] += f

        @pl.when(t_global >= first_ragged)
        def _():
            rows = (jax.lax.broadcasted_iota(jnp.int32, f.shape, 0)
                    + t_global * tile_rows)
            acc_ref[...] += jnp.where(rows < n_rows, f, 0.0)
    else:
        acc_ref[...] += f

    @pl.when(i == pl.num_programs(1) - 1)
    def _():
        # Single cross-lane reduction per core, once per kernel invocation.
        s = jnp.sum(acc_ref[...])
        r_ids = jax.lax.broadcasted_iota(jnp.int32, out_ref.shape, 0)
        c_ids = jax.lax.broadcasted_iota(jnp.int32, out_ref.shape, 1)
        out_ref[...] = jnp.where((r_ids == 0) & (c_ids == 0), s, 0.0)


def _focal_elem_unscaled(x, t, gamma):
    """Elementwise exp(-g*bce)*bce in plain jnp (only for a <128-elem tail)."""
    x = x.astype(jnp.float32)
    t = t.astype(jnp.float32)
    bce = jnp.maximum(x, 0.0) - x * t + jnp.log1p(jnp.exp(-jnp.abs(x)))
    return jnp.exp(-gamma * bce) * bce


def focal_loss(inputs, targets, alpha=0.25, gamma=2.0):
    """Pallas TPU focal loss; returns a scalar mean over all elements."""
    assert inputs.shape == targets.shape
    n = inputs.size
    alpha = float(alpha)
    gamma = float(gamma)

    x = inputs.reshape(-1)
    t = targets.reshape(-1)

    n_rows = n // LANES
    n_main = n_rows * LANES

    # Ragged (<128-element) tail handled in plain jnp; avoids padding the
    # whole array (an extra full HBM read+write) for a handful of elements.
    tail_sum = None
    if n_main < n:
        tail_sum = jnp.sum(_focal_elem_unscaled(x[n_main:], t[n_main:], gamma))

    if n_rows == 0:
        # Input smaller than one 128-lane row: nothing for the kernel to do.
        return (tail_sum * jnp.float32(alpha)) / jnp.float32(n)

    if n_main == n:
        x2 = x.reshape(n_rows, LANES)              # free reshape, no copy
        t2 = t.reshape(n_rows, LANES)
    else:
        x2 = x[:n_main].reshape(n_rows, LANES)
        t2 = t[:n_main].reshape(n_rows, LANES)

    # Tile rows: multiple of 8 sublanes, as large as possible up to the cap.
    tile_rows = min(MAX_TILE_ROWS,
                    ((n_rows + SUBLANES - 1) // SUBLANES) * SUBLANES)
    n_tiles = (n_rows + tile_rows - 1) // tile_rows
    n_split = 2 if n_tiles >= 2 else 1             # megacore split (helps v7x)
    tiles_per_core = (n_tiles + n_split - 1) // n_split
    needs_mask = (n_split * tiles_per_core * tile_rows) != n_rows

    def in_index_map(c, i):
        # Clamp so a possible extra tile on the last core stays in-bounds;
        # its contribution is masked to zero inside the kernel.
        return (jnp.minimum(c * tiles_per_core + i, n_tiles - 1), 0)

    kernel = functools.partial(
        _focal_loss_kernel,
        gamma=gamma,
        n_rows=int(n_rows), tile_rows=int(tile_rows),
        tiles_per_core=int(tiles_per_core), needs_mask=bool(needs_mask))

    partials = pl.pallas_call(
        kernel,
        out_shape=jax.ShapeDtypeStruct((SUBLANES, n_split * LANES), jnp.float32),
        grid_spec=pltpu.PrefetchScalarGridSpec(
            num_scalar_prefetch=0,
            grid=(n_split, tiles_per_core),
            in_specs=[
                pl.BlockSpec((tile_rows, LANES), in_index_map),
                pl.BlockSpec((tile_rows, LANES), in_index_map),
            ],
            out_specs=pl.BlockSpec((SUBLANES, LANES), lambda c, i: (0, c)),
            scratch_shapes=[pltpu.VMEM((tile_rows, LANES), jnp.float32)],
        ),
        compiler_params=pltpu.CompilerParams(
            dimension_semantics=("parallel", "arbitrary"),
        ),
    )(x2, t2)

    total = jnp.sum(partials)
    if tail_sum is not None:
        total = total + tail_sum
    # alpha and the mean (1/N) applied once, on the final scalar.
    return (total * jnp.float32(alpha)) / jnp.float32(n)


def focal_loss_ref(inputs, targets, alpha=0.25, gamma=2.0):
    # Matches the PyTorch module exactly ("plain alpha" focal-loss variant).
    x = inputs.astype(jnp.float32)
    t = targets.astype(jnp.float32)
    bce = jnp.maximum(x, 0.0) - x * t + jnp.log1p(jnp.exp(-jnp.abs(x)))
    pt = jnp.exp(-bce)
    return jnp.mean(alpha * pt ** gamma * bce)


if __name__ == "__main__":
    key = jax.random.PRNGKey(0)
    k1, k2 = jax.random.split(key)

    # Small NCHW-like shapes (the loss is shape-agnostic / elementwise).
    shape = (2, 4, 16, 16)
    inputs = jax.random.normal(k1, shape, dtype=jnp.float32)            # logits
    targets = jax.random.bernoulli(k2, 0.5, shape).astype(jnp.float32)  # {0,1}

    out = focal_loss(inputs, targets, alpha=0.25, gamma=2.0)
    out = jax.block_until_ready(out)

    ref = focal_loss_ref(inputs, targets, alpha=0.25, gamma=2.0)
    assert jnp.allclose(out, ref, rtol=1e-5, atol=1e-5), (out, ref)

    print("KERNEL_OK")
</pallas_src>

<mosaic_0001>
module attributes {stable_mosaic.version = 11 : i64} {
  func.func @_focal_loss_kernel(%arg0: i32, %arg1: i32, %arg2: memref<16x128xf32, #tpu.memory_space<vmem>>, %arg3: memref<16x128xf32, #tpu.memory_space<vmem>>, %arg4: memref<8x128xf32, #tpu.memory_space<vmem>>, %arg5: memref<16x128xf32, #tpu.memory_space<vmem>>) attributes {dimension_semantics = [#tpu.dimension_semantics<parallel>, #tpu.dimension_semantics<arbitrary>], iteration_bounds = array<i64: 1, 1>, scalar_prefetch = 0 : i64, scratch_operands = 1 : i64, tpu.core_type = #tpu.core_type<tc>, window_params = [{transform_indices = @transform_0, window_bounds = array<i64: 16, 128>}, {transform_indices = @transform_1, window_bounds = array<i64: 16, 128>}, {transform_indices = @transform_2, window_bounds = array<i64: 8, 128>}]} {
    %c0_i32 = arith.constant 0 : i32
    %0 = arith.cmpi eq, %arg1, %c0_i32 : i32
    %1 = arith.extui %0 : i1 to i32
    %c0_i32_0 = arith.constant 0 : i32
    %2 = arith.cmpi ne, %1, %c0_i32_0 : i32
    scf.if %2 {
      %cst_12 = arith.constant 0.000000e+00 : f32
      %25 = vector.broadcast %cst_12 : f32 to vector<16x128xf32>
      %c0_13 = arith.constant 0 : index
      %c0_14 = arith.constant 0 : index
      %26 = vector.load %arg5[%c0_13, %c0_14] : memref<16x128xf32, #tpu.memory_space<vmem>>, vector<16x128xf32>
      tpu.vector_store %arg5[%c0_13, %c0_14], %25 {strides = array<i32>} : memref<16x128xf32, #tpu.memory_space<vmem>>, vector<16x128xf32>,
    } else {
    }
    %c0 = arith.constant 0 : index
    %c0_1 = arith.constant 0 : index
    %3 = vector.load %arg2[%c0, %c0_1] : memref<16x128xf32, #tpu.memory_space<vmem>>, vector<16x128xf32>
    %c0_2 = arith.constant 0 : index
    %c0_3 = arith.constant 0 : index
    %4 = vector.load %arg3[%c0_2, %c0_3] : memref<16x128xf32, #tpu.memory_space<vmem>>, vector<16x128xf32>
    %cst = arith.constant 0.000000e+00 : f32
    %5 = vector.broadcast %cst : f32 to vector<16x128xf32>
    %6 = arith.maximumf %3, %5 : vector<16x128xf32>
    %7 = arith.mulf %3, %4 : vector<16x128xf32>
    %8 = arith.subf %6, %7 : vector<16x128xf32>
    %9 = math.absf %3 : vector<16x128xf32>
    %cst_4 = arith.constant 0.000000e+00 : f32
    %10 = vector.broadcast %cst_4 : f32 to vector<16x128xf32>
    %11 = arith.subf %10, %9 : vector<16x128xf32>
    %12 = math.exp %11 : vector<16x128xf32>
    %13 = math.log1p %12 : vector<16x128xf32>
    %14 = arith.addf %8, %13 : vector<16x128xf32>
    %cst_5 = arith.constant -2.000000e+00 : f32
    %15 = vector.broadcast %cst_5 : f32 to vector<16x128xf32>
    %16 = arith.mulf %15, %14 : vector<16x128xf32>
    %17 = math.exp %16 : vector<16x128xf32>
    %18 = arith.mulf %17, %14 : vector<16x128xf32>
    %c0_6 = arith.constant 0 : index
    %c0_7 = arith.constant 0 : index
    %19 = vector.load %arg5[%c0_6, %c0_7] : memref<16x128xf32, #tpu.memory_space<vmem>>, vector<16x128xf32>
    %20 = arith.addf %19, %18 : vector<16x128xf32>
    %c0_8 = arith.constant 0 : index
    %c0_9 = arith.constant 0 : index
    %21 = vector.load %arg5[%c0_8, %c0_9] : memref<16x128xf32, #tpu.memory_space<vmem>>, vector<16x128xf32>
    tpu.vector_store %arg5[%c0_8, %c0_9], %20 {strides = array<i32>} : memref<16x128xf32, #tpu.memory_space<vmem>>, vector<16x128xf32>,
    %c0_i32_10 = arith.constant 0 : i32
    %22 = arith.cmpi eq, %arg1, %c0_i32_10 : i32
    %23 = arith.extui %22 : i1 to i32
    %c0_i32_11 = arith.constant 0 : i32
    %24 = arith.cmpi ne, %23, %c0_i32_11 : i32
    scf.if %24 {
      %c0_12 = arith.constant 0 : index
      %c0_13 = arith.constant 0 : index
      %25 = vector.load %arg5[%c0_12, %c0_13] : memref<16x128xf32, #tpu.memory_space<vmem>>, vector<16x128xf32>
      %26 = vector.shape_cast %25 : vector<16x128xf32> to vector<1x16x128xf32>
      %cst_14 = arith.constant dense<0.000000e+00> : vector<1xf32>
      %27 = vector.multi_reduction <add>, %26, %cst_14 [1, 2] : vector<1x16x128xf32> to vector<1xf32>
      %28 = vector.shape_cast %27 : vector<1xf32> to vector<1x1x1xf32>
      %29 = vector.extract %28[0, 0, 0] : f32 from vector<1x1x1xf32>
      %30 = tpu.iota {dimensions = array<i32: 0>} : vector<8x128xi32>
      %31 = tpu.iota {dimensions = array<i32: 1>} : vector<8x128xi32>
      %c0_i32_15 = arith.constant 0 : i32
      %32 = vector.broadcast %c0_i32_15 : i32 to vector<8x128xi32>
      %33 = arith.cmpi eq, %30, %32 : vector<8x128xi32>
      %c0_i32_16 = arith.constant 0 : i32
      %34 = vector.broadcast %c0_i32_16 : i32 to vector<8x128xi32>
      %35 = arith.cmpi eq, %31, %34 : vector<8x128xi32>
      %36 = arith.andi %33, %35 : vector<8x128xi1>
      %cst_17 = arith.constant 0.000000e+00 : f32
      %37 = vector.broadcast %29 : f32 to vector<8x128xf32>
      %38 = vector.broadcast %cst_17 : f32 to vector<8x128xf32>
      %39 = arith.select %36, %37, %38 : vector<8x128xi1>, vector<8x128xf32>
      %c0_18 = arith.constant 0 : index
      %c0_19 = arith.constant 0 : index
      %40 = vector.load %arg4[%c0_18, %c0_19] : memref<8x128xf32, #tpu.memory_space<vmem>>, vector<8x128xf32>
      tpu.vector_store %arg4[%c0_18, %c0_19], %39 {strides = array<i32>} : memref<8x128xf32, #tpu.memory_space<vmem>>, vector<8x128xf32>,
    } else {
    }
    return
  }
  func.func @transform_0(%arg0: i32, %arg1: i32) -> (i32, i32) {
    %c1_i32 = arith.constant 1 : i32
    %0 = arith.muli %arg0, %c1_i32 : i32
    %1 = arith.addi %0, %arg1 : i32
    %c0_i32 = arith.constant 0 : i32
    %2 = arith.minsi %1, %c0_i32 : i32
    %c0_i32_0 = arith.constant 0 : i32
    %c0_i32_1 = arith.constant 0 : i32
    return %2, %c0_i32_0 : i32, i32
  }
  func.func @transform_1(%arg0: i32, %arg1: i32) -> (i32, i32) {
    %c1_i32 = arith.constant 1 : i32
    %0 = arith.muli %arg0, %c1_i32 : i32
    %1 = arith.addi %0, %arg1 : i32
    %c0_i32 = arith.constant 0 : i32
    %2 = arith.minsi %1, %c0_i32 : i32
    %c0_i32_0 = arith.constant 0 : i32
    %c0_i32_1 = arith.constant 0 : i32
    return %2, %c0_i32_0 : i32, i32
  }
  func.func @transform_2(%arg0: i32, %arg1: i32) -> (i32, i32) {
    %c0_i32 = arith.constant 0 : i32
    %c0_i32_0 = arith.constant 0 : i32
    return %c0_i32, %arg0 : i32, i32
  }
}

</mosaic_0001>

<bundles_post_ra>
// kernel: tpu_custom_call.1
= control target key start
LH: loop header
LB: loop body
LE: loop exit
PB: predicated region body
PF: predicated region fallthrough
CT: control target
= control target key end

     0   :  { %7 = vsyncpa [#allocation4], 0  ;;  %s277_s0 = inlined_call_operand.hbm [shape: f32[16,128], index: 0, kind: input, shape index: {}]   ;;  %s278_s1 = inlined_call_operand.hbm [shape: f32[16,128], index: 1, kind: input, shape index: {}]   ;;  %s279_s2 = inlined_call_operand.hbm [shape: f32[8,128], index: 2, kind: output, shape index: {}]  }
   0x1   :  { %8 = vsyncpa [#allocation7], 0 }
   0x2   :  { %9 = vsyncpa [#allocation5], 0  ;;  %s248_s9 = smov [#allocation3]  }
   0x3   :  { %s21_s10 = sshll.u32 %s248_s9, 4  ;;  %s22_s10 = int_to_ptr.vmem [resolvable:$true] %s21_s10 }
   0x4   :  { %s190_s11 = scalar_lea.vmem %s22_s10, 256  ;;  %p195_p1 = scmp.lt.s32.totalorder %s22_s10, %s22_s10 }
   0x5   :  { %p191_p0 = scmp.ne.s32.totalorder %s22_s10, %s190_s11  ;;  %p196_p2 = scmp.lt.s32.totalorder %s190_s11, %s190_s11 }
   0x7   :  { %p197_p3 = por %p196_p2, %p195_p1 }
   0x9   :  { %p198_p4 = pnand %p197_p3, %p191_p0 }
   0xb   :  { %201 = shalt.err (!%p198_p4)
}
   0xc   :  { %s249_s12 = smov 128   ;;  %s250_s13 = smov 8  }
   0xd   :  { %27 = dma.hbm_to_vmem [thread:$0]  %s277_s0, 256, %s22_s10, [#allocation4], %s249_s12, %s249_s12, %s250_s13  }
   0xe   :  { %s251_s16 = smov [#allocation6]  }
   0xf   :  { %s39_s17 = sshll.u32 %s251_s16, 4  ;;  %s40_s17 = int_to_ptr.vmem [resolvable:$true] %s39_s17 }
  0x10   :  { %s210_s18 = scalar_lea.vmem %s40_s17, 256  ;;  %p215_p6 = scmp.lt.s32.totalorder %s40_s17, %s40_s17 }
  0x11   :  { %p211_p5 = scmp.ne.s32.totalorder %s40_s17, %s210_s18  ;;  %p216_p7 = scmp.lt.s32.totalorder %s210_s18, %s210_s18 }
  0x13   :  { %p217_p8 = por %p216_p7, %p215_p6 }
  0x15   :  { %p218_p9 = pnand %p217_p8, %p211_p5 }
  0x17   :  { %221 = shalt.err (!%p218_p9)
}
  0x18   :  { %45 = dma.hbm_to_vmem [thread:$0]  %s278_s1, 256, %s40_s17, [#allocation7], %s249_s12, %s249_s12, %s250_s13  }
  0x19   :  { %242 = dma.done.wait [#allocation4], 256  }
  0x1a   :  { %243 = vsyncadd [#allocation4], 4294967040 }
  0x1b   :  { %244 = dma.done.wait [#allocation7], 256  }
  0x1c   :  { %245 = vsyncadd [#allocation7], 4294967040  ;;  %v66_v0 = vld [vmem:[#allocation3] sm:$0xff]  ;;  %v67_v1 = vld [vmem:[#allocation3 + $0x8] sm:$0xff]  ;;  %v133_v52 = vlaneseq  ;;  %s252_s0 = smov [#allocation8]  }
  0x1d   :  { %v76_v2 = vand.u32 2147483647, %v66_v0  ;;  %v77_v3 = vand.u32 2147483647, %v67_v1  ;;  %v68_v14 = vld [vmem:[#allocation6] sm:$0xff]  ;;  %v69_v15 = vld [vmem:[#allocation6 + $0x8] sm:$0xff] }
  0x1e   :  { %v70_v17 = vmax.f32 %v66_v0, 0.0  ;;  %v72_v18 = vmul.f32 %v68_v14, %v66_v0  ;;  %v71_v21 = vmax.f32 %v67_v1, 0.0  ;;  %v73_v22 = vmul.f32 %v69_v15, %v67_v1  ;;  %s149_s1 = sshll.u32 %s252_s0, 4  ;;  %s150_s1 = int_to_ptr.vmem [resolvable:$true] %s149_s1 }
  0x1f   :  { %v78_v4 = vsub.f32 0.0, %v76_v2  ;;  %v79_v5 = vsub.f32 0.0, %v77_v3  ;;  %v134_v53 = vshrl.u32 %v133_v52, 7  ;;  %v136_v54 = vand.u32 127, %v133_v52  ;;  %s222_s22 = scalar_lea.vmem %s150_s1, 128  ;;  %p227_p11 = scmp.lt.s32.totalorder %s150_s1, %s150_s1 }
  0x20   :  { %v74_v26 = vsub.f32 %v70_v17, %v72_v18  ;;  %v75_v29 = vsub.f32 %v71_v21, %v73_v22  ;;  %p223_p10 = scmp.ne.s32.totalorder %s150_s1, %s222_s22  ;;  %p228_p12 = scmp.lt.s32.totalorder %s222_s22, %s222_s22 }
  0x21   :  { %v80_v6 = vmul.f32 1.442695, %v78_v4  ;;  %v82_v7 = vmul.f32 1.442695, %v79_v5  ;;  %vm137_vm2 = vcmp.eq.s32.totalorder %v134_v53, 0  ;;  %vm138_vm3 = vcmp.eq.s32.totalorder %v136_v54, 0 }
  0x22   :  { %vm139_vm4 = vmand %vm137_vm2, %vm138_vm3  ;;  %p229_p13 = por %p228_p12, %p227_p11 }
  0x23   :  { %170 = vpow2.f32 %v80_v6 }
  0x24   :  { %172 = vpow2.f32 %v82_v7  ;;  %p230_p0 = pnand %p229_p13, %p223_p10 }
  0x30   :  { %v171_v8 = vpop.eup %170 }
  0x31   :  { %v173_v9 = vpop.eup %172  ;;  %v84_v10 = vadd.f32 1.0, %v171_v8  ;;  %v87_v12 = vmul.f32 -0.5, %v171_v8  ;;  %v90_v19 = vand.u32 2147483647, %v171_v8 }
  0x32   :  { %v93_v11 = vadd.f32 1.0, %v173_v9  ;;  %v96_v13 = vmul.f32 -0.5, %v173_v9  ;;  %v99_v23 = vand.u32 2147483647, %v173_v9 }
  0x33   :  { %174 = vlog2.f32 %v84_v10  ;;  %v88_v16 = vadd.f32 1.0, %v87_v12  ;;  %vm91_vm0 = vcmp.lt.f32.partialorder %v90_v19, 0.0004427343 }
  0x34   :  { %176 = vlog2.f32 %v93_v11  ;;  %v97_v20 = vadd.f32 1.0, %v96_v13  ;;  %vm100_vm1 = vcmp.lt.f32.partialorder %v99_v23, 0.0004427343 }
  0x35   :  { %v89_v24 = vmul.f32 %v171_v8, %v88_v16 }
  0x36   :  { %v98_v27 = vmul.f32 %v173_v9, %v97_v20 }
  0x40   :  { %v175_v25 = vpop.eup %174 }
  0x41   :  { %v177_v28 = vpop.eup %176  ;;  %v86_v30 = vmul.f32 0.6931472, %v175_v25 }
  0x42   :  { %v95_v31 = vmul.f32 0.6931472, %v177_v28 }
  0x43   :  { %v92_v32 = vsel %vm91_vm0, %v89_v24, %v86_v30 }
  0x44   :  { %v101_v33 = vsel %vm100_vm1, %v98_v27, %v95_v31  ;;  %v102_v34 = vadd.f32 %v92_v32, %v74_v26 }
  0x45   :  { %v103_v35 = vadd.f32 %v101_v33, %v75_v29 }
  0x46   :  { %v104_v36 = vmul.f32 -2.0, %v102_v34 }
  0x47   :  { %v105_v37 = vmul.f32 -2.0, %v103_v35 }
  0x48   :  { %v106_v38 = vmul.f32 1.442695, %v104_v36 }
  0x49   :  { %v108_v39 = vmul.f32 1.442695, %v105_v37 }
  0x4a   :  { %178 = vpow2.f32 %v106_v38 }
  0x4b   :  { %180 = vpow2.f32 %v108_v39 }
  0x57   :  { %v179_v40 = vpop.eup %178 }
  0x58   :  { %v181_v41 = vpop.eup %180  ;;  %v110_v42 = vmul.f32 %v179_v40, %v102_v34 }
  0x59   :  { %v111_v43 = vmul.f32 %v181_v41, %v103_v35 }
  0x5b   :  { %v123_v44 = vadd.f32 %v111_v43, %v110_v42 }
  0x5d   :  { %124 = vadd.xlane.f32.xlu0 %v123_v44 }
  0xe6   :  { %v125_v45 = vpop.xlane.xlu0 %124 }
  0xe7   :  { %v126_v46 = vrot.slane %v125_v45, 4 }
  0xe9   :  { %v127_v47 = vadd.f32 %v126_v46, %v125_v45 }
  0xeb   :  { %v128_v48 = vrot.slane %v127_v47, 2 }
  0xed   :  { %v129_v49 = vadd.f32 %v128_v48, %v127_v47 }
  0xef   :  { %v130_v50 = vrot.slane %v129_v49, 1 }
  0xf1   :  { %v131_v51 = vadd.f32 %v130_v50, %v129_v49 }
  0xf3   :  { %163 = vpush %v131_v51 }
 0x124   :  { %s164_s21 = spop %163 }
 0x125   :  { %v140_v55 = vstv %s164_s21 }
 0x126   :  { %v141_v56 = vsel %vm139_vm4, %v140_v55, 0.0 }
 0x127   :  { %142 = vst [vmem:[#allocation8] sm:$0xff] %v141_v56 }
 0x128   :  { %233 = shalt.err (!%p230_p0)
}
 0x129   :  { %152 = dma.vmem_to_hbm [thread:$0]  %s150_s1, 128, %s279_s2, [#allocation5]  }
 0x12a   :  { %246 = dma.done.wait [#allocation5], 128  }
 0x12b   :  { %247 = vsyncadd [#allocation5], 4294967168 }
 0x12c   :  { %156 = vsyncpa [#allocation4], 1 }
 0x12d   :  { %157 = vsyncpa [#allocation7], 1 }
 0x12e   :  { %158 = vsyncpa [#allocation5], 1 }

</bundles_post_ra>
